<compile_context>
chip_gen: v6e
topology: v6e:2x2x1
jax: 0.10.0
libtpu: 0.0.40
codegen_flags: <defaults>
</compile_context>

<pallas_src>
import jax
import jax.numpy as jnp
from jax.experimental import pallas as pl
from jax.experimental.pallas import tpu as pltpu

_LANES = 1024          # lane-dense last dim (large multiple of 128)
_SUBLANES = 8          # keep the row dim a multiple of the sublane count
_MAX_TILE_ROWS = 512   # 512 x 1024 f32 = 2 MiB per tile buffer


def _linreg_kernel(w_ref, b_ref, x_ref, o_ref):
    # w_ref / b_ref: (1,) scalars in SMEM; x_ref / o_ref: (tile_rows, 1024) VMEM tiles.
    w = w_ref[0]
    b = b_ref[0]
    o_ref[...] = x_ref[...] * w + b


def linear_regression_forward(x: jax.Array, weight: jax.Array, bias: jax.Array) -> jax.Array:
    """Pallas TPU implementation of nn.Linear(1, 1) forward.

    x:      (..., 1) input (any float dtype; computed in float32)
    weight: (1, 1)   (out_features, in_features)
    bias:   (1,)
    returns same shape and dtype as x
    """
    orig_shape = x.shape
    orig_dtype = x.dtype
    n = x.size

    x_f32 = x.astype(jnp.float32)
    w_smem = weight.reshape(1).astype(jnp.float32)
    b_smem = bias.reshape(1).astype(jnp.float32)

    # --- lane-dense slab: pad & reshape (N,) -> (rows_padded, 1024) ----------
    rows = max(pl.cdiv(n, _LANES), 1)
    if rows <= _MAX_TILE_ROWS:
        # Single block along rows; round up to a sublane multiple.
        rows_padded = pl.cdiv(rows, _SUBLANES) * _SUBLANES
        tile_rows = rows_padded
    else:
        tile_rows = _MAX_TILE_ROWS
        rows_padded = pl.cdiv(rows, _MAX_TILE_ROWS) * _MAX_TILE_ROWS

    padded_n = rows_padded * _LANES
    x_flat = x_f32.reshape(-1)
    if padded_n != n:
        x_flat = jnp.pad(x_flat, (0, padded_n - n))
    x2d = x_flat.reshape(rows_padded, _LANES)

    grid = (rows_padded // tile_rows,)

    out2d = pl.pallas_call(
        _linreg_kernel,
        out_shape=jax.ShapeDtypeStruct((rows_padded, _LANES), jnp.float32),
        grid=grid,
        in_specs=[
            pl.BlockSpec(memory_space=pltpu.MemorySpace.SMEM),    # weight scalar
            pl.BlockSpec(memory_space=pltpu.MemorySpace.SMEM),    # bias scalar
            pl.BlockSpec((tile_rows, _LANES), lambda i: (i, 0)),  # x tile
        ],
        out_specs=pl.BlockSpec((tile_rows, _LANES), lambda i: (i, 0)),
        compiler_params=pltpu.CompilerParams(
            dimension_semantics=("parallel",),
            vmem_limit_bytes=32 * 1024 * 1024,
        ),
    )(w_smem, b_smem, x2d)

    # Drop padding and restore the original (..., 1) shape / dtype.
    return out2d.reshape(-1)[:n].reshape(orig_shape).astype(orig_dtype)


if __name__ == "__main__":
    key = jax.random.PRNGKey(0)
    k_x, k_w, k_b = jax.random.split(key, 3)

    # Deterministic params (mimicking nn.Linear's U(-1, 1) bound for in_features=1).
    weight = jax.random.uniform(k_w, (1, 1), jnp.float32, minval=-1.0, maxval=1.0)
    bias = jax.random.uniform(k_b, (1,), jnp.float32, minval=-1.0, maxval=1.0)

    # Small input consistent with the module: batch of 8 scalars.
    x = jax.random.normal(k_x, (8, 1), jnp.float32)

    out = linear_regression_forward(x, weight, bias)
    out = jax.block_until_ready(out)

    # Reference check in plain JAX.
    ref = x @ weight.T + bias
    assert out.shape == (8, 1)
    assert out.dtype == x.dtype
    assert jnp.allclose(out, ref, atol=1e-6), "mismatch vs reference"

    print("KERNEL_OK")
</pallas_src>

<mosaic_0001>
module attributes {stable_mosaic.version = 11 : i64} {
  func.func @_linreg_kernel(%arg0: i32, %arg1: memref<1xf32, #tpu.memory_space<smem>>, %arg2: memref<1xf32, #tpu.memory_space<smem>>, %arg3: memref<8x1024xf32, #tpu.memory_space<vmem>>, %arg4: memref<8x1024xf32, #tpu.memory_space<vmem>>) attributes {dimension_semantics = [#tpu.dimension_semantics<parallel>], iteration_bounds = array<i64: 1>, scalar_prefetch = 0 : i64, scratch_operands = 0 : i64, tpu.core_type = #tpu.core_type<tc>, window_params = [{transform_indices = @transform_0, window_bounds = array<i64: 1>}, {transform_indices = @transform_1, window_bounds = array<i64: 1>}, {transform_indices = @transform_2, window_bounds = array<i64: 8, 1024>}, {transform_indices = @transform_3, window_bounds = array<i64: 8, 1024>}]} {
    %c0 = arith.constant 0 : index
    %0 = memref.load %arg1[%c0] : memref<1xf32, #tpu.memory_space<smem>>
    %c0_0 = arith.constant 0 : index
    %1 = memref.load %arg2[%c0_0] : memref<1xf32, #tpu.memory_space<smem>>
    %c0_1 = arith.constant 0 : index
    %c0_2 = arith.constant 0 : index
    %2 = vector.load %arg3[%c0_1, %c0_2] : memref<8x1024xf32, #tpu.memory_space<vmem>>, vector<8x1024xf32>
    %3 = vector.broadcast %0 : f32 to vector<8x1024xf32>
    %4 = arith.mulf %2, %3 : vector<8x1024xf32>
    %5 = vector.broadcast %1 : f32 to vector<8x1024xf32>
    %6 = arith.addf %4, %5 : vector<8x1024xf32>
    %c0_3 = arith.constant 0 : index
    %c0_4 = arith.constant 0 : index
    %7 = vector.load %arg4[%c0_3, %c0_4] : memref<8x1024xf32, #tpu.memory_space<vmem>>, vector<8x1024xf32>
    tpu.vector_store %arg4[%c0_3, %c0_4], %6 {strides = array<i32>} : memref<8x1024xf32, #tpu.memory_space<vmem>>, vector<8x1024xf32>,
    return
  }
  func.func @transform_0(%arg0: i32) -> i32 {
    %c0_i32 = arith.constant 0 : i32
    %c0_i32_0 = arith.constant 0 : i32
    return %c0_i32 : i32
  }
  func.func @transform_1(%arg0: i32) -> i32 {
    %c0_i32 = arith.constant 0 : i32
    %c0_i32_0 = arith.constant 0 : i32
    return %c0_i32 : i32
  }
  func.func @transform_2(%arg0: i32) -> (i32, i32) {
    %c0_i32 = arith.constant 0 : i32
    %c0_i32_0 = arith.constant 0 : i32
    return %arg0, %c0_i32 : i32, i32
  }
  func.func @transform_3(%arg0: i32) -> (i32, i32) {
    %c0_i32 = arith.constant 0 : i32
    %c0_i32_0 = arith.constant 0 : i32
    return %arg0, %c0_i32 : i32, i32
  }
}

</mosaic_0001>

<bundles_post_ra>
// kernel: tpu_custom_call.1
= control target key start
LH: loop header
LB: loop body
LE: loop exit
PB: predicated region body
PF: predicated region fallthrough
CT: control target
= control target key end

     0   :  { %10 = vsyncpa [#allocation5], 0  ;;  %s160_s0 = inlined_call_operand.<no memory space> [shape: f32[1], index: 0, kind: input, shape index: {}]   ;;  %s161_s1 = inlined_call_operand.<no memory space> [shape: f32[1], index: 1, kind: input, shape index: {}]   ;;  %s162_s2 = inlined_call_operand.hbm [shape: f32[8,1024], index: 2, kind: input, shape index: {}]   ;;  %s163_s3 = inlined_call_operand.hbm [shape: f32[8,1024], index: 3, kind: output, shape index: {}]  }
   0x1   :  { %11 = vsyncpa [#allocation6], 0  ;;  %s126_s12 = smov [#allocation4]  }
   0x2   :  { %s22_s13 = sshll.u32 %s126_s12, 4  ;;  %s23_s13 = int_to_ptr.vmem [resolvable:$true] %s22_s13 }
   0x3   :  { %s90_s14 = scalar_lea.vmem %s23_s13, 1024  ;;  %p95_p1 = scmp.lt.s32.totalorder %s23_s13, %s23_s13 }
   0x4   :  { %p91_p0 = scmp.ne.s32.totalorder %s23_s13, %s90_s14  ;;  %p96_p2 = scmp.lt.s32.totalorder %s90_s14, %s90_s14 }
   0x6   :  { %p97_p3 = por %p96_p2, %p95_p1 }
   0x8   :  { %p98_p4 = pnand %p97_p3, %p91_p0 }
   0xa   :  { %101 = shalt.err (!%p98_p4)
}
   0xb   :  { %25 = dma.hbm_to_vmem [thread:$0]  %s162_s2, 1024, %s23_s13, [#allocation5]  }
   0xc   :  { %122 = dma.done.wait [#allocation5], 1024  }
   0xd   :  { %123 = vsyncadd [#allocation5], 4294966272  ;;  %v39_v0 = vstv %s160_s0  ;;  %v31_v1 = vld [vmem:[#allocation4] sm:$0xff]  ;;  %v48_v2 = vstv %s161_s1  ;;  %v32_v3 = vld [vmem:[#allocation4 + $0x8] sm:$0xff]  ;;  %s127_s0 = smov [#allocation7]  }
   0xe   :  { %v33_v4 = vld [vmem:[#allocation4 + $0x10] sm:$0xff]  ;;  %v40_v5 = vmul.f32 %v39_v0, %v31_v1  ;;  %v41_v6 = vmul.f32 %v39_v0, %v32_v3  ;;  %v34_v8 = vld [vmem:[#allocation4 + $0x18] sm:$0xff]  ;;  %v35_v9 = vld [vmem:[#allocation4 + $0x20] sm:$0xff]  ;;  %s71_s2 = sshll.u32 %s127_s0, 4  ;;  %s72_s2 = int_to_ptr.vmem [resolvable:$true] %s71_s2 }
   0xf   :  { %v42_v7 = vmul.f32 %v39_v0, %v33_v4  ;;  %v36_v10 = vld [vmem:[#allocation4 + $0x28] sm:$0xff]  ;;  %v43_v11 = vmul.f32 %v39_v0, %v34_v8  ;;  %v44_v12 = vmul.f32 %v39_v0, %v35_v9  ;;  %v37_v14 = vld [vmem:[#allocation4 + $0x30] sm:$0xff]  ;;  %v38_v15 = vld [vmem:[#allocation4 + $0x38] sm:$0xff]  ;;  %s102_s1 = scalar_lea.vmem %s72_s2, 1024  ;;  %p107_p6 = scmp.lt.s32.totalorder %s72_s2, %s72_s2 }
  0x10   :  { %v45_v13 = vmul.f32 %v39_v0, %v36_v10  ;;  %v49_v16 = vadd.f32 %v48_v2, %v40_v5  ;;  %v50_v17 = vadd.f32 %v48_v2, %v41_v6  ;;  %v46_v19 = vmul.f32 %v39_v0, %v37_v14  ;;  %p103_p5 = scmp.ne.s32.totalorder %s72_s2, %s102_s1  ;;  %p108_p7 = scmp.lt.s32.totalorder %s102_s1, %s102_s1 }
  0x11   :  { %v51_v18 = vadd.f32 %v48_v2, %v42_v7  ;;  %v52_v20 = vadd.f32 %v48_v2, %v43_v11  ;;  %v53_v21 = vadd.f32 %v48_v2, %v44_v12  ;;  %v47_v23 = vmul.f32 %v39_v0, %v38_v15 }
  0x12   :  { %v54_v22 = vadd.f32 %v48_v2, %v45_v13  ;;  %57 = vst [vmem:[#allocation7] sm:$0xff] %v49_v16  ;;  %58 = vst [vmem:[#allocation7 + $0x8] sm:$0xff] %v50_v17  ;;  %v55_v24 = vadd.f32 %v48_v2, %v46_v19  ;;  %p109_p8 = por %p108_p7, %p107_p6 }
  0x13   :  { %59 = vst [vmem:[#allocation7 + $0x10] sm:$0xff] %v51_v18  ;;  %60 = vst [vmem:[#allocation7 + $0x18] sm:$0xff] %v52_v20  ;;  %v56_v25 = vadd.f32 %v48_v2, %v47_v23 }
  0x14   :  { %61 = vst [vmem:[#allocation7 + $0x20] sm:$0xff] %v53_v21  ;;  %62 = vst [vmem:[#allocation7 + $0x28] sm:$0xff] %v54_v22  ;;  %p110_p9 = pnand %p109_p8, %p103_p5 }
  0x15   :  { %63 = vst [vmem:[#allocation7 + $0x30] sm:$0xff] %v55_v24  ;;  %64 = vst [vmem:[#allocation7 + $0x38] sm:$0xff] %v56_v25 }
  0x16   :  { %113 = shalt.err (!%p110_p9)
}
  0x17   :  { %74 = dma.vmem_to_hbm [thread:$0]  %s72_s2, 1024, %s163_s3, [#allocation6]  }
  0x18   :  { %124 = dma.done.wait [#allocation6], 1024  }
  0x19   :  { %125 = vsyncadd [#allocation6], 4294966272 }
  0x1a   :  { %78 = vsyncpa [#allocation5], 1 }
  0x1b   :  { %79 = vsyncpa [#allocation6], 1 }

</bundles_post_ra>
